<compile_context>
chip_gen: v6e
topology: v6e:2x2x1
jax: 0.10.0
libtpu: 0.0.40
codegen_flags: <defaults>
</compile_context>

<pallas_src>
import functools

import jax
import jax.numpy as jnp
from jax import lax
from jax.experimental import pallas as pl
from jax.experimental.pallas import tpu as pltpu


def _basic_conv_kernel(x_ref, wb_ref, scale_ref, shift_ref, o_ref, ypad_ref, *,
                       pad, stride, K, H, Hout, batches, relu):
    # x_ref:     (B, H, W*Cin)          input rows; (j, c) folded into lanes
    # wb_ref:    (K, W*Cin, Wout*Cout)  banded weight slab per kh (column pad baked in)
    # scale_ref: (1, W*Cin)             folded BN scale, pre-tiled over j
    # shift_ref: (1, W*Cin)             folded BN shift, pre-tiled over j
    # o_ref:     (B, Hout, Wout*Cout)   lane-dense output tile
    # ypad_ref:  (B, Hp, W*Cin) VMEM    row-padded post-BN/ReLU activation
    _, Hp, WC = ypad_ref.shape

    # Zero ONLY the row halo (columns are baked into the weight band); the
    # interior rows are fully overwritten below.  Re-zero every step so the
    # per-core scratch stays correct under "parallel" sharding.
    if pad > 0:
        zeros_halo = jnp.zeros((batches, pad, WC), ypad_ref.dtype)
        ypad_ref[:, 0:pad, :] = zeros_halo
        ypad_ref[:, pad + H:Hp, :] = zeros_halo

    # BatchNorm (eval mode, folded running stats) + ReLU in f32; single cast on
    # store (only the MXU operands are narrowed when mxu_dtype is bf16).
    x = x_ref[...].astype(jnp.float32)                      # (B, H, W*Cin)
    y = x * scale_ref[...] + shift_ref[...]
    if relu:
        y = jnp.maximum(y, 0.0)
    ypad_ref[:, pad:pad + H, :] = y.astype(ypad_ref.dtype)  # lane offset 0: unmasked stores

    # Conv2d (no bias): per batch, K accumulated row-slab matmuls on the MXU.
    # kw loop, column padding and Cout are baked into the banded weight columns,
    # so the matmul result is already the lane-dense (Hout, Wout*Cout) tile.
    for b in range(batches):
        acc = None
        for kh in range(K):
            if stride == 1:
                lhs = ypad_ref[b, kh:kh + Hout, :]
            else:
                # TODO(synk): strided sublane reads relayout; for stride>1 write
                # only the needed rows into the scratch (or band over kh too).
                h_span = stride * (Hout - 1) + 1
                lhs = ypad_ref[b][kh:kh + h_span:stride, :]
            d = jnp.dot(lhs, wb_ref[kh], preferred_element_type=jnp.float32)
            acc = d if acc is None else acc + d
        o_ref[b] = acc.astype(o_ref.dtype)


def _num_tensorcores_per_device():
    # Heuristic: v7x exposes 2 TensorCores per JAX device; earlier gens 1.
    try:
        kind = jax.devices()[0].device_kind.lower()
    except Exception:
        return 1
    return 2 if "7" in kind else 1


def basic_conv_forward(x_nchw, weight_oihw, gamma, beta, running_mean, running_var,
                       *, stride=1, padding=1, eps=1e-5, use_bn=True, relu=True,
                       mxu_dtype=jnp.float32, grid_steps=None):
    """Forward of BasicConv (2-D conv path, no bias) via a Pallas TPU kernel."""
    N, Cin, H, W = x_nchw.shape
    Cout, Cin_w, K, K2 = weight_oihw.shape
    assert Cin == Cin_w and K == K2

    Hout = (H + 2 * padding - K) // stride + 1
    Wout = (W + 2 * padding - K) // stride + 1
    Hp = H + 2 * padding

    # ---------------- wrapper glue (no padded HBM copy of the input) ----------------
    # NCHW -> (N, H, W*Cin): one transpose, then a free reshape.
    # TODO(synk): if the surrounding model keeps activations NHWC end-to-end,
    # this transpose and the output one below disappear entirely (they dominate
    # HBM traffic at these shapes).
    x_rows = jnp.transpose(x_nchw, (0, 2, 3, 1)).reshape(N, H, W * Cin)

    # Fold BN running stats; tile over W so they broadcast over the (j, c) lanes.
    if use_bn:
        scale_c = (gamma / jnp.sqrt(running_var + eps)).astype(jnp.float32)    # (Cin,)
        shift_c = (beta - running_mean * scale_c).astype(jnp.float32)          # (Cin,)
    else:
        scale_c = jnp.ones((Cin,), jnp.float32)
        shift_c = jnp.zeros((Cin,), jnp.float32)
    scale_t = jnp.tile(scale_c, W).reshape(1, W * Cin)
    shift_t = jnp.tile(shift_c, W).reshape(1, W * Cin)

    # Banded weight slab with the COLUMN padding baked in:
    #   Wb[kh, p*Cin + c, j*Cout + co] = w[co, c, kh, p + pad - j*stride]  (0 outside band)
    w_hwio = jnp.transpose(weight_oihw, (2, 3, 1, 0)).astype(jnp.float32)      # (K,K,Cin,Cout)
    sel = (jnp.arange(W)[None, :, None]
           == (jnp.arange(Wout)[None, None, :] * stride
               + jnp.arange(K)[:, None, None] - padding)).astype(jnp.float32)  # (K, W, Wout)
    wb = jnp.einsum("hkcd,kpj->hpcjd", w_hwio, sel)
    wb = wb.reshape(K, W * Cin, Wout * Cout).astype(mxu_dtype)

    # VMEM budget guard: the slab grows multiplicatively in W, Cin, Cout.
    wb_bytes = K * W * Cin * Wout * Cout * jnp.dtype(mxu_dtype).itemsize
    if wb_bytes > 16 * 1024 * 1024:
        # TODO(synk): add a Wout*Cout grid axis (128-512 lane blocks per step)
        # before scaling past toy shapes; budget against 64 MiB VMEM on v7x.
        raise ValueError(
            f"banded weight slab is {wb_bytes / 2**20:.1f} MiB; tile Wout*Cout first")
    # Note: fully unmasked (lane-dense) output stores rely on Wout*Cout being a
    # multiple of 128; other channel counts stay correct but use masked stores.

    # Grid: 1 step on single-TC chips (batch folded into M), num-TC steps on v7x.
    if grid_steps is None:
        grid_steps = _num_tensorcores_per_device()
    grid_steps = max(1, min(int(grid_steps), N))
    if N % grid_steps != 0:
        grid_steps = 1
    B = N // grid_steps

    kernel = functools.partial(
        _basic_conv_kernel,
        pad=padding, stride=stride, K=K, H=H, Hout=Hout, batches=B, relu=relu)
    out_shape = jax.ShapeDtypeStruct((N, Hout, Wout * Cout), x_nchw.dtype)

    def _call(single_buffer_invariants):
        inv_kwargs = {}
        if single_buffer_invariants:
            # Grid-invariant operands (constant index_map) never re-DMA: ask for
            # a single buffer instead of the default double buffer.
            inv_kwargs = dict(pipeline_mode=pl.Buffered(buffer_count=1))
        grid_spec = pltpu.PrefetchScalarGridSpec(
            num_scalar_prefetch=0,
            grid=(grid_steps,),
            in_specs=[
                pl.BlockSpec((B, H, W * Cin), lambda n: (n, 0, 0)),
                pl.BlockSpec((K, W * Cin, Wout * Cout), lambda n: (0, 0, 0), **inv_kwargs),
                pl.BlockSpec((1, W * Cin), lambda n: (0, 0), **inv_kwargs),
                pl.BlockSpec((1, W * Cin), lambda n: (0, 0), **inv_kwargs),
            ],
            out_specs=pl.BlockSpec((B, Hout, Wout * Cout), lambda n: (n, 0, 0)),
            scratch_shapes=[pltpu.VMEM((B, Hp, W * Cin), mxu_dtype)],
        )
        return pl.pallas_call(
            kernel,
            out_shape=out_shape,
            grid_spec=grid_spec,
            compiler_params=pltpu.CompilerParams(dimension_semantics=("parallel",)),
        )(x_rows, wb, scale_t, shift_t)

    try:
        out_rows = _call(True)
    except Exception:
        # Fallback if this JAX build rejects pl.Buffered(buffer_count=1).
        out_rows = _call(False)

    # (N, Hout, Wout*Cout) -> NCHW (reshape is free; one output transpose remains).
    out_nhwc = out_rows.reshape(N, Hout, Wout, Cout)
    return jnp.transpose(out_nhwc, (0, 3, 1, 2))


def _reference_forward(x_nchw, weight_oihw, gamma, beta, running_mean, running_var,
                       *, stride=1, padding=1, eps=1e-5):
    # Pure-JAX reference (eval-mode BN -> ReLU -> conv2d, no bias).
    inv = gamma / jnp.sqrt(running_var + eps)
    y = (x_nchw - running_mean[None, :, None, None]) * inv[None, :, None, None] \
        + beta[None, :, None, None]
    y = jnp.maximum(y, 0.0)
    return lax.conv_general_dilated(
        y, weight_oihw,
        window_strides=(stride, stride),
        padding=((padding, padding), (padding, padding)),
        dimension_numbers=("NCHW", "OIHW", "NCHW"))


if __name__ == "__main__":
    # BasicConv(in_channels=4, out_channels=8, kernel_size=3, stride=1, padding=1)
    N, Cin, H, W = 2, 4, 16, 16
    Cout, K, stride, padding = 8, 3, 1, 1

    key = jax.random.PRNGKey(0)
    kx, kw, kg, kb, km, kv = jax.random.split(key, 6)

    x = jax.random.normal(kx, (N, Cin, H, W), dtype=jnp.float32)
    weight = jax.random.normal(kw, (Cout, Cin, K, K), dtype=jnp.float32) * 0.1
    gamma = 1.0 + 0.1 * jax.random.normal(kg, (Cin,), dtype=jnp.float32)
    beta = 0.1 * jax.random.normal(kb, (Cin,), dtype=jnp.float32)
    running_mean = 0.1 * jax.random.normal(km, (Cin,), dtype=jnp.float32)
    running_var = 1.0 + 0.1 * jax.random.uniform(kv, (Cin,), dtype=jnp.float32)

    ref = _reference_forward(x, weight, gamma, beta, running_mean, running_var,
                             stride=stride, padding=padding)

    # Default path (grid auto-selected, f32 MXU operands) -- tight tolerance.
    out = basic_conv_forward(x, weight, gamma, beta, running_mean, running_var,
                             stride=stride, padding=padding)
    out = jax.block_until_ready(out)
    assert out.shape == (N, Cout, H, W)
    assert jnp.allclose(out, ref, atol=1e-4, rtol=1e-4)

    # Explicit two-step "parallel" grid (v7x-style batch sharding) -- same numerics.
    out2 = basic_conv_forward(x, weight, gamma, beta, running_mean, running_var,
                              stride=stride, padding=padding, grid_steps=2)
    out2 = jax.block_until_ready(out2)
    assert jnp.allclose(out2, ref, atol=1e-4, rtol=1e-4)

    # bf16 MXU-operand path (v6e/v7x recommendation) -- looser tolerance.
    out_bf16 = basic_conv_forward(x, weight, gamma, beta, running_mean, running_var,
                                  stride=stride, padding=padding,
                                  mxu_dtype=jnp.bfloat16)
    out_bf16 = jax.block_until_ready(out_bf16)
    assert jnp.allclose(out_bf16, ref, atol=3e-2, rtol=3e-2)

    print("KERNEL_OK")
</pallas_src>

<mosaic_0001>
module attributes {stable_mosaic.version = 11 : i64} {
  func.func @_basic_conv_kernel(%arg0: i32, %arg1: memref<2x16x64xf32, #tpu.memory_space<vmem>>, %arg2: memref<3x64x128xf32, #tpu.memory_space<vmem>>, %arg3: memref<1x64xf32, #tpu.memory_space<vmem>>, %arg4: memref<1x64xf32, #tpu.memory_space<vmem>>, %arg5: memref<2x16x128xf32, #tpu.memory_space<vmem>>, %arg6: memref<2x18x64xf32, #tpu.memory_space<vmem>>) attributes {dimension_semantics = [#tpu.dimension_semantics<parallel>], iteration_bounds = array<i64: 1>, scalar_prefetch = 0 : i64, scratch_operands = 1 : i64, tpu.core_type = #tpu.core_type<tc>, window_params = [{transform_indices = @transform_0, window_bounds = array<i64: 2, 16, 64>}, {pipeline_mode = #tpu.pipeline_mode<synchronous>, transform_indices = @transform_1, window_bounds = array<i64: 3, 64, 128>}, {pipeline_mode = #tpu.pipeline_mode<synchronous>, transform_indices = @transform_2, window_bounds = array<i64: 1, 64>}, {pipeline_mode = #tpu.pipeline_mode<synchronous>, transform_indices = @transform_3, window_bounds = array<i64: 1, 64>}, {transform_indices = @transform_4, window_bounds = array<i64: 2, 16, 128>}]} {
    %cst = arith.constant 0.000000e+00 : f32
    %0 = vector.broadcast %cst : f32 to vector<2x1x64xf32>
    %c0 = arith.constant 0 : index
    %c0_0 = arith.constant 0 : index
    %c0_1 = arith.constant 0 : index
    %1 = vector.load %arg6[%c0, %c0_0, %c0_1] : memref<2x18x64xf32, #tpu.memory_space<vmem>>, vector<2x1x64xf32>
    tpu.vector_store %arg6[%c0, %c0_0, %c0_1], %0 {strides = array<i32>} : memref<2x18x64xf32, #tpu.memory_space<vmem>>, vector<2x1x64xf32>,
    %c0_2 = arith.constant 0 : index
    %c17 = arith.constant 17 : index
    %c0_3 = arith.constant 0 : index
    %2 = vector.load %arg6[%c0_2, %c17, %c0_3] : memref<2x18x64xf32, #tpu.memory_space<vmem>>, vector<2x1x64xf32>
    tpu.vector_store %arg6[%c0_2, %c17, %c0_3], %0 {strides = array<i32>} : memref<2x18x64xf32, #tpu.memory_space<vmem>>, vector<2x1x64xf32>,
    %c0_4 = arith.constant 0 : index
    %c0_5 = arith.constant 0 : index
    %c0_6 = arith.constant 0 : index
    %3 = vector.load %arg1[%c0_4, %c0_5, %c0_6] : memref<2x16x64xf32, #tpu.memory_space<vmem>>, vector<2x16x64xf32>
    %c0_7 = arith.constant 0 : index
    %c0_8 = arith.constant 0 : index
    %4 = vector.load %arg3[%c0_7, %c0_8] : memref<1x64xf32, #tpu.memory_space<vmem>>, vector<1x64xf32>
    %5 = vector.shape_cast %4 : vector<1x64xf32> to vector<1x1x64xf32>
    %6 = vector.broadcast %5 : vector<1x1x64xf32> to vector<2x16x64xf32>
    %7 = arith.mulf %3, %6 : vector<2x16x64xf32>
    %c0_9 = arith.constant 0 : index
    %c0_10 = arith.constant 0 : index
    %8 = vector.load %arg4[%c0_9, %c0_10] : memref<1x64xf32, #tpu.memory_space<vmem>>, vector<1x64xf32>
    %9 = vector.shape_cast %8 : vector<1x64xf32> to vector<1x1x64xf32>
    %10 = vector.broadcast %9 : vector<1x1x64xf32> to vector<2x16x64xf32>
    %11 = arith.addf %7, %10 : vector<2x16x64xf32>
    %cst_11 = arith.constant 0.000000e+00 : f32
    %12 = vector.broadcast %cst_11 : f32 to vector<2x16x64xf32>
    %13 = arith.maximumf %11, %12 : vector<2x16x64xf32>
    %c0_12 = arith.constant 0 : index
    %c1 = arith.constant 1 : index
    %c0_13 = arith.constant 0 : index
    %14 = vector.load %arg6[%c0_12, %c1, %c0_13] : memref<2x18x64xf32, #tpu.memory_space<vmem>>, vector<2x16x64xf32>
    tpu.vector_store %arg6[%c0_12, %c1, %c0_13], %13 {strides = array<i32>} : memref<2x18x64xf32, #tpu.memory_space<vmem>>, vector<2x16x64xf32>,
    %c0_14 = arith.constant 0 : index
    %c0_15 = arith.constant 0 : index
    %c0_16 = arith.constant 0 : index
    %15 = vector.load %arg6[%c0_14, %c0_15, %c0_16] : memref<2x18x64xf32, #tpu.memory_space<vmem>>, vector<1x16x64xf32>
    %16 = vector.shape_cast %15 : vector<1x16x64xf32> to vector<16x64xf32>
    %c0_17 = arith.constant 0 : index
    %c0_18 = arith.constant 0 : index
    %c0_19 = arith.constant 0 : index
    %17 = vector.load %arg2[%c0_17, %c0_18, %c0_19] : memref<3x64x128xf32, #tpu.memory_space<vmem>>, vector<1x64x128xf32>
    %18 = vector.shape_cast %17 : vector<1x64x128xf32> to vector<64x128xf32>
    %cst_20 = arith.constant dense<0.000000e+00> : vector<16x128xf32>
    %19 = tpu.matmul %16, %18, %cst_20 {dimension_numbers = #tpu.dot_dimension_numbers<[1], [0], [0], [1], [0, 0, 1, 1], [], []>} : vector<16x64xf32>, vector<64x128xf32>, vector<16x128xf32> -> vector<16x128xf32>
    %c0_21 = arith.constant 0 : index
    %c1_22 = arith.constant 1 : index
    %c0_23 = arith.constant 0 : index
    %20 = vector.load %arg6[%c0_21, %c1_22, %c0_23] : memref<2x18x64xf32, #tpu.memory_space<vmem>>, vector<1x16x64xf32>
    %21 = vector.shape_cast %20 : vector<1x16x64xf32> to vector<16x64xf32>
    %c1_24 = arith.constant 1 : index
    %c0_25 = arith.constant 0 : index
    %c0_26 = arith.constant 0 : index
    %22 = vector.load %arg2[%c1_24, %c0_25, %c0_26] : memref<3x64x128xf32, #tpu.memory_space<vmem>>, vector<1x64x128xf32>
    %23 = vector.shape_cast %22 : vector<1x64x128xf32> to vector<64x128xf32>
    %cst_27 = arith.constant dense<0.000000e+00> : vector<16x128xf32>
    %24 = tpu.matmul %21, %23, %cst_27 {dimension_numbers = #tpu.dot_dimension_numbers<[1], [0], [0], [1], [0, 0, 1, 1], [], []>} : vector<16x64xf32>, vector<64x128xf32>, vector<16x128xf32> -> vector<16x128xf32>
    %25 = arith.addf %19, %24 : vector<16x128xf32>
    %c0_28 = arith.constant 0 : index
    %c2 = arith.constant 2 : index
    %c0_29 = arith.constant 0 : index
    %26 = vector.load %arg6[%c0_28, %c2, %c0_29] : memref<2x18x64xf32, #tpu.memory_space<vmem>>, vector<1x16x64xf32>
    %27 = vector.shape_cast %26 : vector<1x16x64xf32> to vector<16x64xf32>
    %c2_30 = arith.constant 2 : index
    %c0_31 = arith.constant 0 : index
    %c0_32 = arith.constant 0 : index
    %28 = vector.load %arg2[%c2_30, %c0_31, %c0_32] : memref<3x64x128xf32, #tpu.memory_space<vmem>>, vector<1x64x128xf32>
    %29 = vector.shape_cast %28 : vector<1x64x128xf32> to vector<64x128xf32>
    %cst_33 = arith.constant dense<0.000000e+00> : vector<16x128xf32>
    %30 = tpu.matmul %27, %29, %cst_33 {dimension_numbers = #tpu.dot_dimension_numbers<[1], [0], [0], [1], [0, 0, 1, 1], [], []>} : vector<16x64xf32>, vector<64x128xf32>, vector<16x128xf32> -> vector<16x128xf32>
    %31 = arith.addf %25, %30 : vector<16x128xf32>
    %c0_34 = arith.constant 0 : index
    %c0_35 = arith.constant 0 : index
    %c0_36 = arith.constant 0 : index
    %32 = vector.load %arg5[%c0_34, %c0_35, %c0_36] : memref<2x16x128xf32, #tpu.memory_space<vmem>>, vector<1x16x128xf32>
    %33 = vector.shape_cast %32 : vector<1x16x128xf32> to vector<16x128xf32>
    %34 = vector.shape_cast %31 : vector<16x128xf32> to vector<1x16x128xf32>
    tpu.vector_store %arg5[%c0_34, %c0_35, %c0_36], %34 {strides = array<i32>} : memref<2x16x128xf32, #tpu.memory_space<vmem>>, vector<1x16x128xf32>,
    %c1_37 = arith.constant 1 : index
    %c0_38 = arith.constant 0 : index
    %c0_39 = arith.constant 0 : index
    %35 = vector.load %arg6[%c1_37, %c0_38, %c0_39] : memref<2x18x64xf32, #tpu.memory_space<vmem>>, vector<1x16x64xf32>
    %36 = vector.shape_cast %35 : vector<1x16x64xf32> to vector<16x64xf32>
    %c0_40 = arith.constant 0 : index
    %c0_41 = arith.constant 0 : index
    %c0_42 = arith.constant 0 : index
    %37 = vector.load %arg2[%c0_40, %c0_41, %c0_42] : memref<3x64x128xf32, #tpu.memory_space<vmem>>, vector<1x64x128xf32>
    %38 = vector.shape_cast %37 : vector<1x64x128xf32> to vector<64x128xf32>
    %cst_43 = arith.constant dense<0.000000e+00> : vector<16x128xf32>
    %39 = tpu.matmul %36, %38, %cst_43 {dimension_numbers = #tpu.dot_dimension_numbers<[1], [0], [0], [1], [0, 0, 1, 1], [], []>} : vector<16x64xf32>, vector<64x128xf32>, vector<16x128xf32> -> vector<16x128xf32>
    %c1_44 = arith.constant 1 : index
    %c1_45 = arith.constant 1 : index
    %c0_46 = arith.constant 0 : index
    %40 = vector.load %arg6[%c1_44, %c1_45, %c0_46] : memref<2x18x64xf32, #tpu.memory_space<vmem>>, vector<1x16x64xf32>
    %41 = vector.shape_cast %40 : vector<1x16x64xf32> to vector<16x64xf32>
    %c1_47 = arith.constant 1 : index
    %c0_48 = arith.constant 0 : index
    %c0_49 = arith.constant 0 : index
    %42 = vector.load %arg2[%c1_47, %c0_48, %c0_49] : memref<3x64x128xf32, #tpu.memory_space<vmem>>, vector<1x64x128xf32>
    %43 = vector.shape_cast %42 : vector<1x64x128xf32> to vector<64x128xf32>
    %cst_50 = arith.constant dense<0.000000e+00> : vector<16x128xf32>
    %44 = tpu.matmul %41, %43, %cst_50 {dimension_numbers = #tpu.dot_dimension_numbers<[1], [0], [0], [1], [0, 0, 1, 1], [], []>} : vector<16x64xf32>, vector<64x128xf32>, vector<16x128xf32> -> vector<16x128xf32>
    %45 = arith.addf %39, %44 : vector<16x128xf32>
    %c1_51 = arith.constant 1 : index
    %c2_52 = arith.constant 2 : index
    %c0_53 = arith.constant 0 : index
    %46 = vector.load %arg6[%c1_51, %c2_52, %c0_53] : memref<2x18x64xf32, #tpu.memory_space<vmem>>, vector<1x16x64xf32>
    %47 = vector.shape_cast %46 : vector<1x16x64xf32> to vector<16x64xf32>
    %c2_54 = arith.constant 2 : index
    %c0_55 = arith.constant 0 : index
    %c0_56 = arith.constant 0 : index
    %48 = vector.load %arg2[%c2_54, %c0_55, %c0_56] : memref<3x64x128xf32, #tpu.memory_space<vmem>>, vector<1x64x128xf32>
    %49 = vector.shape_cast %48 : vector<1x64x128xf32> to vector<64x128xf32>
    %cst_57 = arith.constant dense<0.000000e+00> : vector<16x128xf32>
    %50 = tpu.matmul %47, %49, %cst_57 {dimension_numbers = #tpu.dot_dimension_numbers<[1], [0], [0], [1], [0, 0, 1, 1], [], []>} : vector<16x64xf32>, vector<64x128xf32>, vector<16x128xf32> -> vector<16x128xf32>
    %51 = arith.addf %45, %50 : vector<16x128xf32>
    %c1_58 = arith.constant 1 : index
    %c0_59 = arith.constant 0 : index
    %c0_60 = arith.constant 0 : index
    %52 = vector.load %arg5[%c1_58, %c0_59, %c0_60] : memref<2x16x128xf32, #tpu.memory_space<vmem>>, vector<1x16x128xf32>
    %53 = vector.shape_cast %52 : vector<1x16x128xf32> to vector<16x128xf32>
    %54 = vector.shape_cast %51 : vector<16x128xf32> to vector<1x16x128xf32>
    tpu.vector_store %arg5[%c1_58, %c0_59, %c0_60], %54 {strides = array<i32>} : memref<2x16x128xf32, #tpu.memory_space<vmem>>, vector<1x16x128xf32>,
    return
  }
  func.func @transform_0(%arg0: i32) -> (i32, i32, i32) {
    %c0_i32 = arith.constant 0 : i32
    %c0_i32_0 = arith.constant 0 : i32
    %c0_i32_1 = arith.constant 0 : i32
    return %arg0, %c0_i32, %c0_i32_0 : i32, i32, i32
  }
  func.func @transform_1(%arg0: i32) -> (i32, i32, i32) {
    %c0_i32 = arith.constant 0 : i32
    %c0_i32_0 = arith.constant 0 : i32
    %c0_i32_1 = arith.constant 0 : i32
    %c0_i32_2 = arith.constant 0 : i32
    return %c0_i32, %c0_i32_0, %c0_i32_1 : i32, i32, i32
  }
  func.func @transform_2(%arg0: i32) -> (i32, i32) {
    %c0_i32 = arith.constant 0 : i32
    %c0_i32_0 = arith.constant 0 : i32
    %c0_i32_1 = arith.constant 0 : i32
    return %c0_i32, %c0_i32_0 : i32, i32
  }
  func.func @transform_3(%arg0: i32) -> (i32, i32) {
    %c0_i32 = arith.constant 0 : i32
    %c0_i32_0 = arith.constant 0 : i32
    %c0_i32_1 = arith.constant 0 : i32
    return %c0_i32, %c0_i32_0 : i32, i32
  }
  func.func @transform_4(%arg0: i32) -> (i32, i32, i32) {
    %c0_i32 = arith.constant 0 : i32
    %c0_i32_0 = arith.constant 0 : i32
    %c0_i32_1 = arith.constant 0 : i32
    return %arg0, %c0_i32, %c0_i32_0 : i32, i32, i32
  }
}

module attributes {stable_mosaic.version = 11 : i64} {
  func.func @_basic_conv_kernel(%arg0: i32, %arg1: memref<2x16x64xf32, #tpu.memory_space<vmem>>, %arg2: memref<3x64x128xf32, #tpu.memory_space<vmem>>, %arg3: memref<1x64xf32, #tpu.memory_space<vmem>>, %arg4: memref<1x64xf32, #tpu.memory_space<vmem>>, %arg5: memref<2x16x128xf32, #tpu.memory_space<vmem>>, %arg6: memref<2x18x64xf32, #tpu.memory_space<vmem>>) attributes {dimension_semantics = [#tpu.dimension_semantics<parallel>], iteration_bounds = array<i64: 1>, scalar_prefetch = 0 : i64, scratch_operands = 1 : i64, tpu.core_type = #tpu.core_type<tc>, window_params = [{transform_indices = @transform_0, window_bounds = array<i64: 2, 16, 64>}, {pipeline_mode = #tpu.pipeline_mode<synchronous>, transform_indices = @transform_1, window_bounds = array<i64: 3, 64, 128>}, {pipeline_mode = #tpu.pipeline_mode<synchronous>, transform_indices = @transform_2, window_bounds = array<i64: 1, 64>}, {pipeline_mode = #tpu.pipeline_mode<synchronous>, transform_indices = @transform_3, window_bounds = array<i64: 1, 64>}, {transform_indices = @transform_4, window_bounds = array<i64: 2, 16, 128>}]} {
    %cst = arith.constant 0.000000e+00 : f32
    %0 = vector.broadcast %cst : f32 to vector<2x1x64xf32>
    %c0 = arith.constant 0 : index
    %c0_0 = arith.constant 0 : index
    %c0_1 = arith.constant 0 : index
    %1 = vector.load %arg6[%c0, %c0_0, %c0_1] : memref<2x18x64xf32, #tpu.memory_space<vmem>>, vector<2x1x64xf32>
    tpu.vector_store %arg6[%c0, %c0_0, %c0_1], %0 {strides = array<i32>} : memref<2x18x64xf32, #tpu.memory_space<vmem>>, vector<2x1x64xf32>,
    %c0_2 = arith.constant 0 : index
    %c17 = arith.constant 17 : index
    %c0_3 = arith.constant 0 : index
    %2 = vector.load %arg6[%c0_2, %c17, %c0_3] : memref<2x18x64xf32, #tpu.memory_space<vmem>>, vector<2x1x64xf32>
    tpu.vector_store %arg6[%c0_2, %c17, %c0_3], %0 {strides = array<i32>} : memref<2x18x64xf32, #tpu.memory_space<vmem>>, vector<2x1x64xf32>,
    %c0_4 = arith.constant 0 : index
    %c0_5 = arith.constant 0 : index
    %c0_6 = arith.constant 0 : index
    %3 = vector.load %arg1[%c0_4, %c0_5, %c0_6] : memref<2x16x64xf32, #tpu.memory_space<vmem>>, vector<2x16x64xf32>
    %c0_7 = arith.constant 0 : index
    %c0_8 = arith.constant 0 : index
    %4 = vector.load %arg3[%c0_7, %c0_8] : memref<1x64xf32, #tpu.memory_space<vmem>>, vector<1x64xf32>
    %5 = vector.shape_cast %4 : vector<1x64xf32> to vector<1x1x64xf32>
    %6 = vector.broadcast %5 : vector<1x1x64xf32> to vector<2x16x64xf32>
    %7 = arith.mulf %3, %6 : vector<2x16x64xf32>
    %c0_9 = arith.constant 0 : index
    %c0_10 = arith.constant 0 : index
    %8 = vector.load %arg4[%c0_9, %c0_10] : memref<1x64xf32, #tpu.memory_space<vmem>>, vector<1x64xf32>
    %9 = vector.shape_cast %8 : vector<1x64xf32> to vector<1x1x64xf32>
    %10 = vector.broadcast %9 : vector<1x1x64xf32> to vector<2x16x64xf32>
    %11 = arith.addf %7, %10 : vector<2x16x64xf32>
    %cst_11 = arith.constant 0.000000e+00 : f32
    %12 = vector.broadcast %cst_11 : f32 to vector<2x16x64xf32>
    %13 = arith.maximumf %11, %12 : vector<2x16x64xf32>
    %c0_12 = arith.constant 0 : index
    %c1 = arith.constant 1 : index
    %c0_13 = arith.constant 0 : index
    %14 = vector.load %arg6[%c0_12, %c1, %c0_13] : memref<2x18x64xf32, #tpu.memory_space<vmem>>, vector<2x16x64xf32>
    tpu.vector_store %arg6[%c0_12, %c1, %c0_13], %13 {strides = array<i32>} : memref<2x18x64xf32, #tpu.memory_space<vmem>>, vector<2x16x64xf32>,
    %c0_14 = arith.constant 0 : index
    %c0_15 = arith.constant 0 : index
    %c0_16 = arith.constant 0 : index
    %15 = vector.load %arg6[%c0_14, %c0_15, %c0_16] : memref<2x18x64xf32, #tpu.memory_space<vmem>>, vector<1x16x64xf32>
    %16 = vector.shape_cast %15 : vector<1x16x64xf32> to vector<16x64xf32>
    %c0_17 = arith.constant 0 : index
    %c0_18 = arith.constant 0 : index
    %c0_19 = arith.constant 0 : index
    %17 = vector.load %arg2[%c0_17, %c0_18, %c0_19] : memref<3x64x128xf32, #tpu.memory_space<vmem>>, vector<1x64x128xf32>
    %18 = vector.shape_cast %17 : vector<1x64x128xf32> to vector<64x128xf32>
    %cst_20 = arith.constant dense<0.000000e+00> : vector<16x128xf32>
    %19 = tpu.matmul %16, %18, %cst_20 {dimension_numbers = #tpu.dot_dimension_numbers<[1], [0], [0], [1], [0, 0, 1, 1], [], []>} : vector<16x64xf32>, vector<64x128xf32>, vector<16x128xf32> -> vector<16x128xf32>
    %c0_21 = arith.constant 0 : index
    %c1_22 = arith.constant 1 : index
    %c0_23 = arith.constant 0 : index
    %20 = vector.load %arg6[%c0_21, %c1_22, %c0_23] : memref<2x18x64xf32, #tpu.memory_space<vmem>>, vector<1x16x64xf32>
    %21 = vector.shape_cast %20 : vector<1x16x64xf32> to vector<16x64xf32>
    %c1_24 = arith.constant 1 : index
    %c0_25 = arith.constant 0 : index
    %c0_26 = arith.constant 0 : index
    %22 = vector.load %arg2[%c1_24, %c0_25, %c0_26] : memref<3x64x128xf32, #tpu.memory_space<vmem>>, vector<1x64x128xf32>
    %23 = vector.shape_cast %22 : vector<1x64x128xf32> to vector<64x128xf32>
    %cst_27 = arith.constant dense<0.000000e+00> : vector<16x128xf32>
    %24 = tpu.matmul %21, %23, %cst_27 {dimension_numbers = #tpu.dot_dimension_numbers<[1], [0], [0], [1], [0, 0, 1, 1], [], []>} : vector<16x64xf32>, vector<64x128xf32>, vector<16x128xf32> -> vector<16x128xf32>
    %25 = arith.addf %19, %24 : vector<16x128xf32>
    %c0_28 = arith.constant 0 : index
    %c2 = arith.constant 2 : index
    %c0_29 = arith.constant 0 : index
    %26 = vector.load %arg6[%c0_28, %c2, %c0_29] : memref<2x18x64xf32, #tpu.memory_space<vmem>>, vector<1x16x64xf32>
    %27 = vector.shape_cast %26 : vector<1x16x64xf32> to vector<16x64xf32>
    %c2_30 = arith.constant 2 : index
    %c0_31 = arith.constant 0 : index
    %c0_32 = arith.constant 0 : index
    %28 = vector.load %arg2[%c2_30, %c0_31, %c0_32] : memref<3x64x128xf32, #tpu.memory_space<vmem>>, vector<1x64x128xf32>
    %29 = vector.shape_cast %28 : vector<1x64x128xf32> to vector<64x128xf32>
    %cst_33 = arith.constant dense<0.000000e+00> : vector<16x128xf32>
    %30 = tpu.matmul %27, %29, %cst_33 {dimension_numbers = #tpu.dot_dimension_numbers<[1], [0], [0], [1], [0, 0, 1, 1], [], []>} : vector<16x64xf32>, vector<64x128xf32>, vector<16x128xf32> -> vector<16x128xf32>
    %31 = arith.addf %25, %30 : vector<16x128xf32>
    %c0_34 = arith.constant 0 : index
    %c0_35 = arith.constant 0 : index
    %c0_36 = arith.constant 0 : index
    %32 = vector.load %arg5[%c0_34, %c0_35, %c0_36] : memref<2x16x128xf32, #tpu.memory_space<vmem>>, vector<1x16x128xf32>
    %33 = vector.shape_cast %32 : vector<1x16x128xf32> to vector<16x128xf32>
    %34 = vector.shape_cast %31 : vector<16x128xf32> to vector<1x16x128xf32>
    tpu.vector_store %arg5[%c0_34, %c0_35, %c0_36], %34 {strides = array<i32>} : memref<2x16x128xf32, #tpu.memory_space<vmem>>, vector<1x16x128xf32>,
    %c1_37 = arith.constant 1 : index
    %c0_38 = arith.constant 0 : index
    %c0_39 = arith.constant 0 : index
    %35 = vector.load %arg6[%c1_37, %c0_38, %c0_39] : memref<2x18x64xf32, #tpu.memory_space<vmem>>, vector<1x16x64xf32>
    %36 = vector.shape_cast %35 : vector<1x16x64xf32> to vector<16x64xf32>
    %c0_40 = arith.constant 0 : index
    %c0_41 = arith.constant 0 : index
    %c0_42 = arith.constant 0 : index
    %37 = vector.load %arg2[%c0_40, %c0_41, %c0_42] : memref<3x64x128xf32, #tpu.memory_space<vmem>>, vector<1x64x128xf32>
    %38 = vector.shape_cast %37 : vector<1x64x128xf32> to vector<64x128xf32>
    %cst_43 = arith.constant dense<0.000000e+00> : vector<16x128xf32>
    %39 = tpu.matmul %36, %38, %cst_43 {dimension_numbers = #tpu.dot_dimension_numbers<[1], [0], [0], [1], [0, 0, 1, 1], [], []>} : vector<16x64xf32>, vector<64x128xf32>, vector<16x128xf32> -> vector<16x128xf32>
    %c1_44 = arith.constant 1 : index
    %c1_45 = arith.constant 1 : index
    %c0_46 = arith.constant 0 : index
    %40 = vector.load %arg6[%c1_44, %c1_45, %c0_46] : memref<2x18x64xf32, #tpu.memory_space<vmem>>, vector<1x16x64xf32>
    %41 = vector.shape_cast %40 : vector<1x16x64xf32> to vector<16x64xf32>
    %c1_47 = arith.constant 1 : index
    %c0_48 = arith.constant 0 : index
    %c0_49 = arith.constant 0 : index
    %42 = vector.load %arg2[%c1_47, %c0_48, %c0_49] : memref<3x64x128xf32, #tpu.memory_space<vmem>>, vector<1x64x128xf32>
    %43 = vector.shape_cast %42 : vector<1x64x128xf32> to vector<64x128xf32>
    %cst_50 = arith.constant dense<0.000000e+00> : vector<16x128xf32>
    %44 = tpu.matmul %41, %43, %cst_50 {dimension_numbers = #tpu.dot_dimension_numbers<[1], [0], [0], [1], [0, 0, 1, 1], [], []>} : vector<16x64xf32>, vector<64x128xf32>, vector<16x128xf32> -> vector<16x128xf32>
    %45 = arith.addf %39, %44 : vector<16x128xf32>
    %c1_51 = arith.constant 1 : index
    %c2_52 = arith.constant 2 : index
    %c0_53 = arith.constant 0 : index
    %46 = vector.load %arg6[%c1_51, %c2_52, %c0_53] : memref<2x18x64xf32, #tpu.memory_space<vmem>>, vector<1x16x64xf32>
    %47 = vector.shape_cast %46 : vector<1x16x64xf32> to vector<16x64xf32>
    %c2_54 = arith.constant 2 : index
    %c0_55 = arith.constant 0 : index
    %c0_56 = arith.constant 0 : index
    %48 = vector.load %arg2[%c2_54, %c0_55, %c0_56] : memref<3x64x128xf32, #tpu.memory_space<vmem>>, vector<1x64x128xf32>
    %49 = vector.shape_cast %48 : vector<1x64x128xf32> to vector<64x128xf32>
    %cst_57 = arith.constant dense<0.000000e+00> : vector<16x128xf32>
    %50 = tpu.matmul %47, %49, %cst_57 {dimension_numbers = #tpu.dot_dimension_numbers<[1], [0], [0], [1], [0, 0, 1, 1], [], []>} : vector<16x64xf32>, vector<64x128xf32>, vector<16x128xf32> -> vector<16x128xf32>
    %51 = arith.addf %45, %50 : vector<16x128xf32>
    %c1_58 = arith.constant 1 : index
    %c0_59 = arith.constant 0 : index
    %c0_60 = arith.constant 0 : index
    %52 = vector.load %arg5[%c1_58, %c0_59, %c0_60] : memref<2x16x128xf32, #tpu.memory_space<vmem>>, vector<1x16x128xf32>
    %53 = vector.shape_cast %52 : vector<1x16x128xf32> to vector<16x128xf32>
    %54 = vector.shape_cast %51 : vector<16x128xf32> to vector<1x16x128xf32>
    tpu.vector_store %arg5[%c1_58, %c0_59, %c0_60], %54 {strides = array<i32>} : memref<2x16x128xf32, #tpu.memory_space<vmem>>, vector<1x16x128xf32>,
    return
  }
  func.func @transform_0(%arg0: i32) -> (i32, i32, i32) {
    %c0_i32 = arith.constant 0 : i32
    %c0_i32_0 = arith.constant 0 : i32
    %c0_i32_1 = arith.constant 0 : i32
    return %arg0, %c0_i32, %c0_i32_0 : i32, i32, i32
  }
  func.func @transform_1(%arg0: i32) -> (i32, i32, i32) {
    %c0_i32 = arith.constant 0 : i32
    %c0_i32_0 = arith.constant 0 : i32
    %c0_i32_1 = arith.constant 0 : i32
    %c0_i32_2 = arith.constant 0 : i32
    return %c0_i32, %c0_i32_0, %c0_i32_1 : i32, i32, i32
  }
  func.func @transform_2(%arg0: i32) -> (i32, i32) {
    %c0_i32 = arith.constant 0 : i32
    %c0_i32_0 = arith.constant 0 : i32
    %c0_i32_1 = arith.constant 0 : i32
    return %c0_i32, %c0_i32_0 : i32, i32
  }
  func.func @transform_3(%arg0: i32) -> (i32, i32) {
    %c0_i32 = arith.constant 0 : i32
    %c0_i32_0 = arith.constant 0 : i32
    %c0_i32_1 = arith.constant 0 : i32
    return %c0_i32, %c0_i32_0 : i32, i32
  }
  func.func @transform_4(%arg0: i32) -> (i32, i32, i32) {
    %c0_i32 = arith.constant 0 : i32
    %c0_i32_0 = arith.constant 0 : i32
    %c0_i32_1 = arith.constant 0 : i32
    return %arg0, %c0_i32, %c0_i32_0 : i32, i32, i32
  }
}

</mosaic_0001>

<bundles_post_ra>
// kernel: tpu_custom_call.1
= control target key start
LH: loop header
LB: loop body
LE: loop exit
PB: predicated region body
PF: predicated region fallthrough
CT: control target
= control target key end

     0   :  { %9 = vsyncpa [#allocation4], 0  ;;  %s1095_s0 = inlined_call_operand.hbm [shape: f32[2,16,64], index: 0, kind: input, shape index: {}]   ;;  %s1096_s1 = inlined_call_operand.hbm [shape: f32[3,64,128], index: 1, kind: input, shape index: {}]   ;;  %s1097_s2 = inlined_call_operand.vmem [shape: f32[1,64], index: 2, kind: input, shape index: {}]   ;;  %s1098_s3 = inlined_call_operand.vmem [shape: f32[1,64], index: 3, kind: input, shape index: {}]   ;;  %s1099_s4 = inlined_call_operand.hbm [shape: f32[2,16,128], index: 4, kind: output, shape index: {}]  }
   0x1   :  { %10 = vsyncpa [#allocation7], 0 }
   0x2   :  { %11 = vsyncpa [#allocation5], 0  ;;  %s922_s15 = smov [#allocation3]  }
   0x3   :  { %s17_s16 = sshll.u32 %s922_s15, 4  ;;  %s18_s16 = int_to_ptr.vmem [resolvable:$true] %s17_s16 }
   0x4   :  { %s864_s17 = scalar_lea.vmem %s18_s16, 512  ;;  %p869_p1 = scmp.lt.s32.totalorder %s18_s16, %s18_s16 }
   0x5   :  { %p865_p0 = scmp.ne.s32.totalorder %s18_s16, %s864_s17  ;;  %p870_p2 = scmp.lt.s32.totalorder %s864_s17, %s864_s17 }
   0x7   :  { %p871_p3 = por %p870_p2, %p869_p1 }
   0x9   :  { %p872_p4 = pnand %p871_p3, %p865_p0 }
   0xb   :  { %875 = shalt.err (!%p872_p4)
}
   0xc   :  { %s923_s18 = smov 128   ;;  %s924_s19 = smov 8  }
   0xd   :  { %23 = dma.hbm_to_vmem [thread:$0]  %s1095_s0, 512, %s18_s16, [#allocation4], %s923_s18, %s923_s18, %s924_s19  }
   0xe   :  { %s925_s22 = smov [#allocation6]  }
   0xf   :  { %s29_s23 = sshll.u32 %s925_s22, 4  ;;  %s30_s23 = int_to_ptr.vmem [resolvable:$true] %s29_s23 }
  0x10   :  { %s884_s24 = scalar_lea.vmem %s30_s23, 3072  ;;  %p889_p6 = scmp.lt.s32.totalorder %s30_s23, %s30_s23 }
  0x11   :  { %p885_p5 = scmp.ne.s32.totalorder %s30_s23, %s884_s24  ;;  %p890_p7 = scmp.lt.s32.totalorder %s884_s24, %s884_s24 }
  0x13   :  { %p891_p8 = por %p890_p7, %p889_p6 }
  0x15   :  { %p892_p9 = pnand %p891_p8, %p885_p5 }
  0x17   :  { %895 = shalt.err (!%p892_p9)
}
  0x18   :  { %35 = dma.hbm_to_vmem [thread:$0]  %s1096_s1, 3072, %s30_s23, [#allocation7], %s923_s18, %s923_s18, %s924_s19  }
  0x19   :  { %916 = dma.done.wait [#allocation4], 512  }
  0x1a   :  { %917 = vsyncadd [#allocation4], 4294966784 }
  0x1b   :  { %918 = dma.done.wait [#allocation7], 3072  }
  0x1c   :  { %919 = vsyncadd [#allocation7], 4294964224  ;;  %vm46_vm0 = vcmask 516096   ;;  %v926_v0 = vmov 0.0   ;;  %v965_v1 = vld [vmem:[#allocation6 + $0x78] sm:$0xff]  ;;  %v969_v3 = vld [vmem:[#allocation6 + $0x70] sm:$0xff] }
  0x1d   :  { %47 = vst.msk [vmem:[#allocation2] sm:$0x1] %vm46_vm0, %v926_v0  ;;  %48 = vst.msk [vmem:[#allocation2 + $0x18] sm:$0x1] %vm46_vm0, %v926_v0  ;;  %v967_v2 = vld [vmem:[#allocation6 + $0x38] sm:$0xff]  ;;  %736 = vmatprep.subr.mxu0 %v965_v1  ;;  %v973_v4 = vld [vmem:[#allocation6 + $0x30] sm:$0xff] }
  0x1e   :  { %49 = vst.msk [vmem:[#allocation2 + $0x11] sm:$0x1] %vm46_vm0, %v926_v0  ;;  %50 = vst.msk [vmem:[#allocation2 + $0x29] sm:$0x1] %vm46_vm0, %v926_v0  ;;  %755 = vmatprep.subr.mxu1 %v967_v2  ;;  %737 = vmatpush3.msra.mxu0 %v965_v1  ;;  %v977_v5 = vld [vmem:[#allocation6 + $0x68] sm:$0xff]  ;;  %v985_v7 = vld [vmem:[#allocation6 + $0x60] sm:$0xff] }
  0x1f   :  { %756 = vmatpush3.msra.mxu1 %v967_v2  ;;  %v979_v6 = vld [vmem:[#allocation6 + $0x28] sm:$0xff]  ;;  %738 = vmatprep.subr.mxu0 %v969_v3  ;;  %v987_v8 = vld [vmem:[#allocation6 + $0x20] sm:$0xff]  ;;  %v991_v9 = vld [vmem:[#allocation6 + $0x58] sm:$0xff]  ;;  %vm81_vm1 = vcmask 523264  }
  0x20   :  { %757 = vmatprep.subr.mxu1 %v973_v4  ;;  %739 = vmatpush3.msra.mxu0 %v969_v3  ;;  %v51_v10 = vld [vmem:[#allocation3] sm:$0xff]  ;;  %v662_v11 = vld [vmem:[%s1097_s2] ss:$0 sm:$0xff]  ;;  %v998_v12 = vld [vmem:[#allocation6 + $0x18] sm:$0xff]  ;;  %s927_s2 = smov [#allocation8]  }
  0x21   :  { %758 = vmatpush3.msra.mxu1 %v973_v4  ;;  %740 = vmatprep.subr.mxu0 %v977_v5  ;;  %v62_v13 = vmul.f32 %v662_v11, %v51_v10  ;;  %v663_v14 = vld [vmem:[%s1098_s3] ss:$0 sm:$0xff]  ;;  %v52_v15 = vld [vmem:[#allocation3 + $0x8] sm:$0xff]  ;;  %v54_v22 = vld [vmem:[#allocation3 + $0x18] sm:$0xff]  ;;  %s649_s3 = sshll.u32 %s927_s2, 4  ;;  %s650_s3 = int_to_ptr.vmem [resolvable:$true] %s649_s3 }
  0x22   :  { %759 = vmatprep.subr.mxu1 %v979_v6  ;;  %741 = vmatpush3.msra.mxu0 %v977_v5  ;;  %v63_v16 = vmul.f32 %v662_v11, %v52_v15  ;;  %v1007_v17 = vld [vmem:[#allocation6 + $0x50] sm:$0xff]  ;;  %v1015_v23 = vld [vmem:[#allocation6 + $0x48] sm:$0xff]  ;;  %v65_v27 = vmul.f32 %v662_v11, %v54_v22  ;;  %v1023_v29 = vld [vmem:[#allocation6 + $0x40] sm:$0xff]  ;;  %s896_s29 = scalar_lea.vmem %s650_s3, 512  ;;  %p901_p11 = scmp.lt.s32.totalorder %s650_s3, %s650_s3 }
  0x23   :  { %760 = vmatpush3.msra.mxu1 %v979_v6  ;;  %742 = vmatprep.subr.mxu0 %v985_v7  ;;  %v1009_v18 = vld [vmem:[#allocation6 + $0x10] sm:$0xff]  ;;  %v73_v19 = vadd.f32 %v663_v14, %v62_v13  ;;  %v1017_v24 = vld [vmem:[#allocation6 + $0x8] sm:$0xff]  ;;  %v1025_v30 = vld [vmem:[#allocation6] sm:$0xff]  ;;  %p897_p10 = scmp.ne.s32.totalorder %s650_s3, %s896_s29  ;;  %p902_p12 = scmp.lt.s32.totalorder %s896_s29, %s896_s29 }
  0x24   :  { %761 = vmatprep.subr.mxu1 %v987_v8  ;;  %743 = vmatpush3.msra.mxu0 %v985_v7  ;;  %v74_v20 = vadd.f32 %v663_v14, %v63_v16  ;;  %v53_v21 = vld [vmem:[#allocation3 + $0x10] sm:$0xff]  ;;  %v76_v32 = vadd.f32 %v663_v14, %v65_v27  ;;  %v1033_v33 = vld [vmem:[#allocation6 + $0xb8] sm:$0xff]  ;;  %v277_v41 = vld [vmem:[#allocation6 + $0xa8] sm:$0xff] }
  0x25   :  { %762 = vmatpush3.msra.mxu1 %v987_v8  ;;  %744 = vmatprep.subr.mxu0 %v991_v9  ;;  %v77_v25 = vmax.f32 %v73_v19, 0.0  ;;  %v64_v26 = vmul.f32 %v662_v11, %v53_v21  ;;  %v278_v40 = vld [vmem:[#allocation6 + $0xb0] sm:$0xff]  ;;  %v276_v42 = vld [vmem:[#allocation6 + $0xa0] sm:$0xff]  ;;  %v275_v43 = vld [vmem:[#allocation6 + $0x98] sm:$0xff]  ;;  %p903_p13 = por %p902_p12, %p901_p11 }
  0x26   :  { %763 = vmatprep.subr.mxu1 %v998_v12  ;;  %745 = vmatpush3.msra.mxu0 %v991_v9  ;;  %v78_v28 = vmax.f32 %v74_v20, 0.0  ;;  %v80_v35 = vmax.f32 %v76_v32, 0.0  ;;  %v274_v44 = vld [vmem:[#allocation6 + $0x90] sm:$0xff]  ;;  %v273_v45 = vld [vmem:[#allocation6 + $0x88] sm:$0xff]  ;;  %v272_v46 = vld [vmem:[#allocation6 + $0x80] sm:$0xff] }
  0x27   :  { %764 = vmatpush3.msra.mxu1 %v998_v12  ;;  %746 = vmatprep.subr.mxu0 %v1007_v17  ;;  %82 = vst.msk [vmem:[#allocation2 + $0x1] sm:$0xff] %vm81_vm1, %v77_v25  ;;  %v75_v31 = vadd.f32 %v663_v14, %v64_v26  ;;  %p904_p0 = pnand %p903_p13, %p897_p10 }
  0x28   :  { %765 = vmatprep.subr.mxu1 %v1009_v18  ;;  %747 = vmatpush3.msra.mxu0 %v1007_v17  ;;  %83 = vst.msk [vmem:[#allocation2 + $0x9] sm:$0xff] %vm81_vm1, %v78_v28  ;;  %85 = vst.msk [vmem:[#allocation2 + $0x21] sm:$0xff] %vm81_vm1, %v80_v35 }
  0x29   :  { %766 = vmatpush3.msra.mxu1 %v1009_v18  ;;  %748 = vmatprep.subr.mxu0 %v1015_v23  ;;  %v79_v34 = vmax.f32 %v75_v31, 0.0 }
  0x2a   :  { %767 = vmatprep.subr.mxu1 %v1017_v24  ;;  %749 = vmatpush3.msra.mxu0 %v1015_v23 }
  0x2b   :  { %768 = vmatpush3.msra.mxu1 %v1017_v24  ;;  %750 = vmatprep.subr.mxu0 %v1023_v29  ;;  %84 = vst.msk [vmem:[#allocation2 + $0x19] sm:$0xff] %vm81_vm1, %v79_v34 }
  0x2c   :  { %769 = vmatprep.subr.mxu1 %v1025_v30  ;;  %751 = vmatpush3.msra.mxu0 %v1023_v29 }
  0x2d   :  { %770 = vmatpush3.msra.mxu1 %v1025_v30  ;;  %774 = vmatprep.subr.mxu0 %v1033_v33 }
  0x2e   :  { %793 = vmatprep.subr.mxu1 %v965_v1  ;;  %v96_v36 = vld [vmem:[#allocation2 + $0x1] sm:$0xff] }
  0x2f   :  { %v86_v37 = vld [vmem:[#allocation2] sm:$0xff]  ;;  %752 = vmatprep.mubr.msk.f32.mxu0 %vm81_vm1, %v96_v36  ;;  %v97_v38 = vld [vmem:[#allocation2 + $0x9] sm:$0xff] }
  0x30   :  { %771 = vmatprep.mubr.msk.f32.mxu1 %vm81_vm1, %v86_v37  ;;  %v87_v39 = vld [vmem:[#allocation2 + $0x8] sm:$0xff]  ;;  %753 = vmatmul.mubr.msk.f32.vlgmr.msra.gmra.mxu0 %vm81_vm1, %v97_v38 }
  0x31   :  { %772 = vmatmul.mubr.msk.f32.vlgmr.msra.gmra.mxu1 %vm81_vm1, %v87_v39  ;;  %775 = vmatpush3.msra.mxu0 %v1033_v33  ;;  %v269_v47 = vld [vmem:[#allocation2 + $0x2] sm:$0xff]  ;;  %v270_v48 = vld [vmem:[#allocation2 + $0xa] sm:$0xff] }
  0x32   :  { %794 = vmatpush3.msra.mxu1 %v965_v1  ;;  %776 = vmatprep.subr.mxu0 %v278_v40  ;;  %v376_v49 = vld [vmem:[#allocation2 + $0x19] sm:$0xff]  ;;  %v377_v50 = vld [vmem:[#allocation2 + $0x21] sm:$0xff] }
  0x33   :  { %795 = vmatprep.subr.mxu1 %v969_v3  ;;  %777 = vmatpush3.msra.mxu0 %v278_v40  ;;  %v366_v51 = vld [vmem:[#allocation2 + $0x18] sm:$0xff]  ;;  %v367_v53 = vld [vmem:[#allocation2 + $0x20] sm:$0xff] }
  0x34   :  { %796 = vmatpush3.msra.mxu1 %v969_v3  ;;  %778 = vmatprep.subr.mxu0 %v277_v41  ;;  %v548_v52 = vld [vmem:[#allocation2 + $0x1a] sm:$0xff]  ;;  %v549_v54 = vld [vmem:[#allocation2 + $0x22] sm:$0xff] }
  0x35   :  { %797 = vmatprep.subr.mxu1 %v977_v5  ;;  %779 = vmatpush3.msra.mxu0 %v277_v41 }
  0x36   :  { %798 = vmatpush3.msra.mxu1 %v977_v5  ;;  %780 = vmatprep.subr.mxu0 %v276_v42 }
  0x37   :  { %799 = vmatprep.subr.mxu1 %v985_v7  ;;  %781 = vmatpush3.msra.mxu0 %v276_v42 }
  0x38   :  { %800 = vmatpush3.msra.mxu1 %v985_v7  ;;  %782 = vmatprep.subr.mxu0 %v275_v43 }
  0x39   :  { %801 = vmatprep.subr.mxu1 %v991_v9  ;;  %783 = vmatpush3.msra.mxu0 %v275_v43 }
  0x3a   :  { %802 = vmatpush3.msra.mxu1 %v991_v9  ;;  %784 = vmatprep.subr.mxu0 %v274_v44 }
  0x3b   :  { %803 = vmatprep.subr.mxu1 %v1007_v17  ;;  %785 = vmatpush3.msra.mxu0 %v274_v44 }
  0x3c   :  { %804 = vmatpush3.msra.mxu1 %v1007_v17  ;;  %786 = vmatprep.subr.mxu0 %v273_v45 }
  0x3d   :  { %805 = vmatprep.subr.mxu1 %v1015_v23  ;;  %787 = vmatpush3.msra.mxu0 %v273_v45 }
  0x3e   :  { %806 = vmatpush3.msra.mxu1 %v1015_v23  ;;  %788 = vmatprep.subr.mxu0 %v272_v46 }
  0x3f   :  { %807 = vmatprep.subr.mxu1 %v1023_v29  ;;  %789 = vmatpush3.msra.mxu0 %v272_v46 }
  0x40   :  { %790 = vmatprep.mubr.msk.f32.mxu0 %vm81_vm1, %v269_v47  ;;  %808 = vmatpush3.msra.mxu1 %v1023_v29 }
  0x41   :  { %791 = vmatmul.mubr.msk.f32.vlgmr.msra.gmra.mxu0 %vm81_vm1, %v270_v48  ;;  %809 = vmatprep.mubr.msk.f32.mxu1 %vm81_vm1, %v376_v49 }
  0x42   :  { %812 = vmatprep.subr.mxu0 %v967_v2  ;;  %831 = vmatprep.subr.mxu1 %v1033_v33 }
  0x43   :  { %810 = vmatmul.mubr.msk.f32.vlgmr.msra.gmra.mxu1 %vm81_vm1, %v377_v50  ;;  %813 = vmatpush3.msra.mxu0 %v967_v2 }
  0x44   :  { %832 = vmatpush3.msra.mxu1 %v1033_v33  ;;  %814 = vmatprep.subr.mxu0 %v973_v4 }
  0x45   :  { %833 = vmatprep.subr.mxu1 %v278_v40  ;;  %815 = vmatpush3.msra.mxu0 %v973_v4 }
  0x46   :  { %834 = vmatpush3.msra.mxu1 %v278_v40  ;;  %816 = vmatprep.subr.mxu0 %v979_v6 }
  0x47   :  { %835 = vmatprep.subr.mxu1 %v277_v41  ;;  %817 = vmatpush3.msra.mxu0 %v979_v6 }
  0x48   :  { %836 = vmatpush3.msra.mxu1 %v277_v41  ;;  %818 = vmatprep.subr.mxu0 %v987_v8 }
  0x49   :  { %837 = vmatprep.subr.mxu1 %v276_v42  ;;  %819 = vmatpush3.msra.mxu0 %v987_v8 }
  0x4a   :  { %838 = vmatpush3.msra.mxu1 %v276_v42  ;;  %820 = vmatprep.subr.mxu0 %v998_v12 }
  0x4b   :  { %839 = vmatprep.subr.mxu1 %v275_v43  ;;  %821 = vmatpush3.msra.mxu0 %v998_v12 }
  0x4c   :  { %840 = vmatpush3.msra.mxu1 %v275_v43  ;;  %822 = vmatprep.subr.mxu0 %v1009_v18 }
  0x4d   :  { %841 = vmatprep.subr.mxu1 %v274_v44  ;;  %823 = vmatpush3.msra.mxu0 %v1009_v18 }
  0x4e   :  { %842 = vmatpush3.msra.mxu1 %v274_v44  ;;  %824 = vmatprep.subr.mxu0 %v1017_v24 }
  0x4f   :  { %843 = vmatprep.subr.mxu1 %v273_v45  ;;  %825 = vmatpush3.msra.mxu0 %v1017_v24 }
  0x50   :  { %844 = vmatpush3.msra.mxu1 %v273_v45  ;;  %826 = vmatprep.subr.mxu0 %v1025_v30 }
  0x51   :  { %845 = vmatprep.subr.mxu1 %v272_v46  ;;  %827 = vmatpush3.msra.mxu0 %v1025_v30 }
  0x52   :  { %828 = vmatprep.mubr.msk.f32.mxu0 %vm81_vm1, %v366_v51  ;;  %846 = vmatpush3.msra.mxu1 %v272_v46 }
  0x53   :  { %847 = vmatprep.mubr.msk.f32.mxu1 %vm81_vm1, %v548_v52  ;;  %829 = vmatmul.mubr.msk.f32.vlgmr.msra.gmra.mxu0 %vm81_vm1, %v367_v53 }
  0x54   :  { %848 = vmatmul.mubr.msk.f32.vlgmr.msra.gmra.mxu1 %vm81_vm1, %v549_v54 }
  0xf0   :  { %v754_v55 = vpop.f32.mrf.mxu0 }
  0xf1   :  { %v773_v56 = vpop.f32.mrf.mxu1 }
  0xf2   :  { %v179_v57 = vpop.f32.mrf.mxu0  ;;  %v266_v59 = vadd.f32 %v773_v56, %v754_v55 }
  0xf3   :  { %v260_v58 = vpop.f32.mrf.mxu1 }
  0xf4   :  { %v261_v61 = vadd.f32 %v260_v58, %v179_v57 }
 0x101   :  { %v792_v60 = vpop.f32.mrf.mxu0 }
 0x102   :  { %v362_v62 = vadd.f32 %v792_v60, %v266_v59 }
 0x103   :  { %v352_v63 = vpop.f32.mrf.mxu0  ;;  %v811_v1 = vpop.f32.mrf.mxu1 }
 0x104   :  { %364 = vst [vmem:[#allocation8 + $0x8] sm:$0xff] %v362_v62  ;;  %v361_v0 = vadd.f32 %v352_v63, %v261_v61 }
 0x105   :  { %v458_v2 = vpop.f32.mrf.mxu1 }
 0x106   :  { %363 = vst [vmem:[#allocation8] sm:$0xff] %v361_v0 }
 0x113   :  { %v830_v3 = vpop.f32.mrf.mxu0 }
 0x114   :  { %v849_v4 = vpop.f32.mrf.mxu1  ;;  %v545_v5 = vadd.f32 %v830_v3, %v811_v1 }
 0x115   :  { %v539_v6 = vpop.f32.mrf.mxu0 }
 0x116   :  { %v640_v7 = vadd.f32 %v849_v4, %v545_v5  ;;  %v540_v8 = vadd.f32 %v539_v6, %v458_v2  ;;  %v630_v9 = vpop.f32.mrf.mxu1 }
 0x118   :  { %643 = vst [vmem:[#allocation8 + $0x18] sm:$0xff] %v640_v7  ;;  %v639_v10 = vadd.f32 %v630_v9, %v540_v8 }
 0x11a   :  { %642 = vst [vmem:[#allocation8 + $0x10] sm:$0xff] %v639_v10 }
 0x11b   :  { %907 = shalt.err (!%p904_p0)
}
 0x11c   :  { %655 = dma.vmem_to_hbm [thread:$0]  %s650_s3, 512, %s1099_s4, [#allocation5], %s923_s18, %s923_s18, %s924_s19  }
 0x11d   :  { %920 = dma.done.wait [#allocation5], 512  }
 0x11e   :  { %921 = vsyncadd [#allocation5], 4294966784 }
 0x11f   :  { %659 = vsyncpa [#allocation4], 1 }
 0x120   :  { %660 = vsyncpa [#allocation7], 1 }
 0x121   :  { %661 = vsyncpa [#allocation5], 1 }

// kernel: tpu_custom_call.1
= control target key start
LH: loop header
LB: loop body
LE: loop exit
PB: predicated region body
PF: predicated region fallthrough
CT: control target
= control target key end

     0   :  { %9 = vsyncpa [#allocation4], 0  ;;  %s1095_s0 = inlined_call_operand.hbm [shape: f32[2,16,64], index: 0, kind: input, shape index: {}]   ;;  %s1096_s1 = inlined_call_operand.hbm [shape: f32[3,64,128], index: 1, kind: input, shape index: {}]   ;;  %s1097_s2 = inlined_call_operand.vmem [shape: f32[1,64], index: 2, kind: input, shape index: {}]   ;;  %s1098_s3 = inlined_call_operand.vmem [shape: f32[1,64], index: 3, kind: input, shape index: {}]   ;;  %s1099_s4 = inlined_call_operand.hbm [shape: f32[2,16,128], index: 4, kind: output, shape index: {}]  }
   0x1   :  { %10 = vsyncpa [#allocation7], 0 }
   0x2   :  { %11 = vsyncpa [#allocation5], 0  ;;  %s922_s15 = smov [#allocation3]  }
   0x3   :  { %s17_s16 = sshll.u32 %s922_s15, 4  ;;  %s18_s16 = int_to_ptr.vmem [resolvable:$true] %s17_s16 }
   0x4   :  { %s864_s17 = scalar_lea.vmem %s18_s16, 512  ;;  %p869_p1 = scmp.lt.s32.totalorder %s18_s16, %s18_s16 }
   0x5   :  { %p865_p0 = scmp.ne.s32.totalorder %s18_s16, %s864_s17  ;;  %p870_p2 = scmp.lt.s32.totalorder %s864_s17, %s864_s17 }
   0x7   :  { %p871_p3 = por %p870_p2, %p869_p1 }
   0x9   :  { %p872_p4 = pnand %p871_p3, %p865_p0 }
   0xb   :  { %875 = shalt.err (!%p872_p4)
}
   0xc   :  { %s923_s18 = smov 128   ;;  %s924_s19 = smov 8  }
   0xd   :  { %23 = dma.hbm_to_vmem [thread:$0]  %s1095_s0, 512, %s18_s16, [#allocation4], %s923_s18, %s923_s18, %s924_s19  }
   0xe   :  { %s925_s22 = smov [#allocation6]  }
   0xf   :  { %s29_s23 = sshll.u32 %s925_s22, 4  ;;  %s30_s23 = int_to_ptr.vmem [resolvable:$true] %s29_s23 }
  0x10   :  { %s884_s24 = scalar_lea.vmem %s30_s23, 3072  ;;  %p889_p6 = scmp.lt.s32.totalorder %s30_s23, %s30_s23 }
  0x11   :  { %p885_p5 = scmp.ne.s32.totalorder %s30_s23, %s884_s24  ;;  %p890_p7 = scmp.lt.s32.totalorder %s884_s24, %s884_s24 }
  0x13   :  { %p891_p8 = por %p890_p7, %p889_p6 }
  0x15   :  { %p892_p9 = pnand %p891_p8, %p885_p5 }
  0x17   :  { %895 = shalt.err (!%p892_p9)
}
  0x18   :  { %35 = dma.hbm_to_vmem [thread:$0]  %s1096_s1, 3072, %s30_s23, [#allocation7], %s923_s18, %s923_s18, %s924_s19  }
  0x19   :  { %916 = dma.done.wait [#allocation4], 512  }
  0x1a   :  { %917 = vsyncadd [#allocation4], 4294966784 }
  0x1b   :  { %918 = dma.done.wait [#allocation7], 3072  }
  0x1c   :  { %919 = vsyncadd [#allocation7], 4294964224  ;;  %vm46_vm0 = vcmask 516096   ;;  %v926_v0 = vmov 0.0   ;;  %v965_v1 = vld [vmem:[#allocation6 + $0x78] sm:$0xff]  ;;  %v969_v3 = vld [vmem:[#allocation6 + $0x70] sm:$0xff] }
  0x1d   :  { %47 = vst.msk [vmem:[#allocation2] sm:$0x1] %vm46_vm0, %v926_v0  ;;  %48 = vst.msk [vmem:[#allocation2 + $0x18] sm:$0x1] %vm46_vm0, %v926_v0  ;;  %v967_v2 = vld [vmem:[#allocation6 + $0x38] sm:$0xff]  ;;  %736 = vmatprep.subr.mxu0 %v965_v1  ;;  %v973_v4 = vld [vmem:[#allocation6 + $0x30] sm:$0xff] }
  0x1e   :  { %49 = vst.msk [vmem:[#allocation2 + $0x11] sm:$0x1] %vm46_vm0, %v926_v0  ;;  %50 = vst.msk [vmem:[#allocation2 + $0x29] sm:$0x1] %vm46_vm0, %v926_v0  ;;  %755 = vmatprep.subr.mxu1 %v967_v2  ;;  %737 = vmatpush3.msra.mxu0 %v965_v1  ;;  %v977_v5 = vld [vmem:[#allocation6 + $0x68] sm:$0xff]  ;;  %v985_v7 = vld [vmem:[#allocation6 + $0x60] sm:$0xff] }
  0x1f   :  { %756 = vmatpush3.msra.mxu1 %v967_v2  ;;  %v979_v6 = vld [vmem:[#allocation6 + $0x28] sm:$0xff]  ;;  %738 = vmatprep.subr.mxu0 %v969_v3  ;;  %v987_v8 = vld [vmem:[#allocation6 + $0x20] sm:$0xff]  ;;  %v991_v9 = vld [vmem:[#allocation6 + $0x58] sm:$0xff]  ;;  %vm81_vm1 = vcmask 523264  }
  0x20   :  { %757 = vmatprep.subr.mxu1 %v973_v4  ;;  %739 = vmatpush3.msra.mxu0 %v969_v3  ;;  %v51_v10 = vld [vmem:[#allocation3] sm:$0xff]  ;;  %v662_v11 = vld [vmem:[%s1097_s2] ss:$0 sm:$0xff]  ;;  %v998_v12 = vld [vmem:[#allocation6 + $0x18] sm:$0xff]  ;;  %s927_s2 = smov [#allocation8]  }
  0x21   :  { %758 = vmatpush3.msra.mxu1 %v973_v4  ;;  %740 = vmatprep.subr.mxu0 %v977_v5  ;;  %v62_v13 = vmul.f32 %v662_v11, %v51_v10  ;;  %v663_v14 = vld [vmem:[%s1098_s3] ss:$0 sm:$0xff]  ;;  %v52_v15 = vld [vmem:[#allocation3 + $0x8] sm:$0xff]  ;;  %v54_v22 = vld [vmem:[#allocation3 + $0x18] sm:$0xff]  ;;  %s649_s3 = sshll.u32 %s927_s2, 4  ;;  %s650_s3 = int_to_ptr.vmem [resolvable:$true] %s649_s3 }
  0x22   :  { %759 = vmatprep.subr.mxu1 %v979_v6  ;;  %741 = vmatpush3.msra.mxu0 %v977_v5  ;;  %v63_v16 = vmul.f32 %v662_v11, %v52_v15  ;;  %v1007_v17 = vld [vmem:[#allocation6 + $0x50] sm:$0xff]  ;;  %v1015_v23 = vld [vmem:[#allocation6 + $0x48] sm:$0xff]  ;;  %v65_v27 = vmul.f32 %v662_v11, %v54_v22  ;;  %v1023_v29 = vld [vmem:[#allocation6 + $0x40] sm:$0xff]  ;;  %s896_s29 = scalar_lea.vmem %s650_s3, 512  ;;  %p901_p11 = scmp.lt.s32.totalorder %s650_s3, %s650_s3 }
  0x23   :  { %760 = vmatpush3.msra.mxu1 %v979_v6  ;;  %742 = vmatprep.subr.mxu0 %v985_v7  ;;  %v1009_v18 = vld [vmem:[#allocation6 + $0x10] sm:$0xff]  ;;  %v73_v19 = vadd.f32 %v663_v14, %v62_v13  ;;  %v1017_v24 = vld [vmem:[#allocation6 + $0x8] sm:$0xff]  ;;  %v1025_v30 = vld [vmem:[#allocation6] sm:$0xff]  ;;  %p897_p10 = scmp.ne.s32.totalorder %s650_s3, %s896_s29  ;;  %p902_p12 = scmp.lt.s32.totalorder %s896_s29, %s896_s29 }
  0x24   :  { %761 = vmatprep.subr.mxu1 %v987_v8  ;;  %743 = vmatpush3.msra.mxu0 %v985_v7  ;;  %v74_v20 = vadd.f32 %v663_v14, %v63_v16  ;;  %v53_v21 = vld [vmem:[#allocation3 + $0x10] sm:$0xff]  ;;  %v76_v32 = vadd.f32 %v663_v14, %v65_v27  ;;  %v1033_v33 = vld [vmem:[#allocation6 + $0xb8] sm:$0xff]  ;;  %v277_v41 = vld [vmem:[#allocation6 + $0xa8] sm:$0xff] }
  0x25   :  { %762 = vmatpush3.msra.mxu1 %v987_v8  ;;  %744 = vmatprep.subr.mxu0 %v991_v9  ;;  %v77_v25 = vmax.f32 %v73_v19, 0.0  ;;  %v64_v26 = vmul.f32 %v662_v11, %v53_v21  ;;  %v278_v40 = vld [vmem:[#allocation6 + $0xb0] sm:$0xff]  ;;  %v276_v42 = vld [vmem:[#allocation6 + $0xa0] sm:$0xff]  ;;  %v275_v43 = vld [vmem:[#allocation6 + $0x98] sm:$0xff]  ;;  %p903_p13 = por %p902_p12, %p901_p11 }
  0x26   :  { %763 = vmatprep.subr.mxu1 %v998_v12  ;;  %745 = vmatpush3.msra.mxu0 %v991_v9  ;;  %v78_v28 = vmax.f32 %v74_v20, 0.0  ;;  %v80_v35 = vmax.f32 %v76_v32, 0.0  ;;  %v274_v44 = vld [vmem:[#allocation6 + $0x90] sm:$0xff]  ;;  %v273_v45 = vld [vmem:[#allocation6 + $0x88] sm:$0xff]  ;;  %v272_v46 = vld [vmem:[#allocation6 + $0x80] sm:$0xff] }
  0x27   :  { %764 = vmatpush3.msra.mxu1 %v998_v12  ;;  %746 = vmatprep.subr.mxu0 %v1007_v17  ;;  %82 = vst.msk [vmem:[#allocation2 + $0x1] sm:$0xff] %vm81_vm1, %v77_v25  ;;  %v75_v31 = vadd.f32 %v663_v14, %v64_v26  ;;  %p904_p0 = pnand %p903_p13, %p897_p10 }
  0x28   :  { %765 = vmatprep.subr.mxu1 %v1009_v18  ;;  %747 = vmatpush3.msra.mxu0 %v1007_v17  ;;  %83 = vst.msk [vmem:[#allocation2 + $0x9] sm:$0xff] %vm81_vm1, %v78_v28  ;;  %85 = vst.msk [vmem:[#allocation2 + $0x21] sm:$0xff] %vm81_vm1, %v80_v35 }
  0x29   :  { %766 = vmatpush3.msra.mxu1 %v1009_v18  ;;  %748 = vmatprep.subr.mxu0 %v1015_v23  ;;  %v79_v34 = vmax.f32 %v75_v31, 0.0 }
  0x2a   :  { %767 = vmatprep.subr.mxu1 %v1017_v24  ;;  %749 = vmatpush3.msra.mxu0 %v1015_v23 }
  0x2b   :  { %768 = vmatpush3.msra.mxu1 %v1017_v24  ;;  %750 = vmatprep.subr.mxu0 %v1023_v29  ;;  %84 = vst.msk [vmem:[#allocation2 + $0x19] sm:$0xff] %vm81_vm1, %v79_v34 }
  0x2c   :  { %769 = vmatprep.subr.mxu1 %v1025_v30  ;;  %751 = vmatpush3.msra.mxu0 %v1023_v29 }
  0x2d   :  { %770 = vmatpush3.msra.mxu1 %v1025_v30  ;;  %774 = vmatprep.subr.mxu0 %v1033_v33 }
  0x2e   :  { %793 = vmatprep.subr.mxu1 %v965_v1  ;;  %v96_v36 = vld [vmem:[#allocation2 + $0x1] sm:$0xff] }
  0x2f   :  { %v86_v37 = vld [vmem:[#allocation2] sm:$0xff]  ;;  %752 = vmatprep.mubr.msk.f32.mxu0 %vm81_vm1, %v96_v36  ;;  %v97_v38 = vld [vmem:[#allocation2 + $0x9] sm:$0xff] }
  0x30   :  { %771 = vmatprep.mubr.msk.f32.mxu1 %vm81_vm1, %v86_v37  ;;  %v87_v39 = vld [vmem:[#allocation2 + $0x8] sm:$0xff]  ;;  %753 = vmatmul.mubr.msk.f32.vlgmr.msra.gmra.mxu0 %vm81_vm1, %v97_v38 }
  0x31   :  { %772 = vmatmul.mubr.msk.f32.vlgmr.msra.gmra.mxu1 %vm81_vm1, %v87_v39  ;;  %775 = vmatpush3.msra.mxu0 %v1033_v33  ;;  %v269_v47 = vld [vmem:[#allocation2 + $0x2] sm:$0xff]  ;;  %v270_v48 = vld [vmem:[#allocation2 + $0xa] sm:$0xff] }
  0x32   :  { %794 = vmatpush3.msra.mxu1 %v965_v1  ;;  %776 = vmatprep.subr.mxu0 %v278_v40  ;;  %v376_v49 = vld [vmem:[#allocation2 + $0x19] sm:$0xff]  ;;  %v377_v50 = vld [vmem:[#allocation2 + $0x21] sm:$0xff] }
  0x33   :  { %795 = vmatprep.subr.mxu1 %v969_v3  ;;  %777 = vmatpush3.msra.mxu0 %v278_v40  ;;  %v366_v51 = vld [vmem:[#allocation2 + $0x18] sm:$0xff]  ;;  %v367_v53 = vld [vmem:[#allocation2 + $0x20] sm:$0xff] }
  0x34   :  { %796 = vmatpush3.msra.mxu1 %v969_v3  ;;  %778 = vmatprep.subr.mxu0 %v277_v41  ;;  %v548_v52 = vld [vmem:[#allocation2 + $0x1a] sm:$0xff]  ;;  %v549_v54 = vld [vmem:[#allocation2 + $0x22] sm:$0xff] }
  0x35   :  { %797 = vmatprep.subr.mxu1 %v977_v5  ;;  %779 = vmatpush3.msra.mxu0 %v277_v41 }
  0x36   :  { %798 = vmatpush3.msra.mxu1 %v977_v5  ;;  %780 = vmatprep.subr.mxu0 %v276_v42 }
  0x37   :  { %799 = vmatprep.subr.mxu1 %v985_v7  ;;  %781 = vmatpush3.msra.mxu0 %v276_v42 }
  0x38   :  { %800 = vmatpush3.msra.mxu1 %v985_v7  ;;  %782 = vmatprep.subr.mxu0 %v275_v43 }
  0x39   :  { %801 = vmatprep.subr.mxu1 %v991_v9  ;;  %783 = vmatpush3.msra.mxu0 %v275_v43 }
  0x3a   :  { %802 = vmatpush3.msra.mxu1 %v991_v9  ;;  %784 = vmatprep.subr.mxu0 %v274_v44 }
  0x3b   :  { %803 = vmatprep.subr.mxu1 %v1007_v17  ;;  %785 = vmatpush3.msra.mxu0 %v274_v44 }
  0x3c   :  { %804 = vmatpush3.msra.mxu1 %v1007_v17  ;;  %786 = vmatprep.subr.mxu0 %v273_v45 }
  0x3d   :  { %805 = vmatprep.subr.mxu1 %v1015_v23  ;;  %787 = vmatpush3.msra.mxu0 %v273_v45 }
  0x3e   :  { %806 = vmatpush3.msra.mxu1 %v1015_v23  ;;  %788 = vmatprep.subr.mxu0 %v272_v46 }
  0x3f   :  { %807 = vmatprep.subr.mxu1 %v1023_v29  ;;  %789 = vmatpush3.msra.mxu0 %v272_v46 }
  0x40   :  { %790 = vmatprep.mubr.msk.f32.mxu0 %vm81_vm1, %v269_v47  ;;  %808 = vmatpush3.msra.mxu1 %v1023_v29 }
  0x41   :  { %791 = vmatmul.mubr.msk.f32.vlgmr.msra.gmra.mxu0 %vm81_vm1, %v270_v48  ;;  %809 = vmatprep.mubr.msk.f32.mxu1 %vm81_vm1, %v376_v49 }
  0x42   :  { %812 = vmatprep.subr.mxu0 %v967_v2  ;;  %831 = vmatprep.subr.mxu1 %v1033_v33 }
  0x43   :  { %810 = vmatmul.mubr.msk.f32.vlgmr.msra.gmra.mxu1 %vm81_vm1, %v377_v50  ;;  %813 = vmatpush3.msra.mxu0 %v967_v2 }
  0x44   :  { %832 = vmatpush3.msra.mxu1 %v1033_v33  ;;  %814 = vmatprep.subr.mxu0 %v973_v4 }
  0x45   :  { %833 = vmatprep.subr.mxu1 %v278_v40  ;;  %815 = vmatpush3.msra.mxu0 %v973_v4 }
  0x46   :  { %834 = vmatpush3.msra.mxu1 %v278_v40  ;;  %816 = vmatprep.subr.mxu0 %v979_v6 }
  0x47   :  { %835 = vmatprep.subr.mxu1 %v277_v41  ;;  %817 = vmatpush3.msra.mxu0 %v979_v6 }
  0x48   :  { %836 = vmatpush3.msra.mxu1 %v277_v41  ;;  %818 = vmatprep.subr.mxu0 %v987_v8 }
  0x49   :  { %837 = vmatprep.subr.mxu1 %v276_v42  ;;  %819 = vmatpush3.msra.mxu0 %v987_v8 }
  0x4a   :  { %838 = vmatpush3.msra.mxu1 %v276_v42  ;;  %820 = vmatprep.subr.mxu0 %v998_v12 }
  0x4b   :  { %839 = vmatprep.subr.mxu1 %v275_v43  ;;  %821 = vmatpush3.msra.mxu0 %v998_v12 }
  0x4c   :  { %840 = vmatpush3.msra.mxu1 %v275_v43  ;;  %822 = vmatprep.subr.mxu0 %v1009_v18 }
  0x4d   :  { %841 = vmatprep.subr.mxu1 %v274_v44  ;;  %823 = vmatpush3.msra.mxu0 %v1009_v18 }
  0x4e   :  { %842 = vmatpush3.msra.mxu1 %v274_v44  ;;  %824 = vmatprep.subr.mxu0 %v1017_v24 }
  0x4f   :  { %843 = vmatprep.subr.mxu1 %v273_v45  ;;  %825 = vmatpush3.msra.mxu0 %v1017_v24 }
  0x50   :  { %844 = vmatpush3.msra.mxu1 %v273_v45  ;;  %826 = vmatprep.subr.mxu0 %v1025_v30 }
  0x51   :  { %845 = vmatprep.subr.mxu1 %v272_v46  ;;  %827 = vmatpush3.msra.mxu0 %v1025_v30 }
  0x52   :  { %828 = vmatprep.mubr.msk.f32.mxu0 %vm81_vm1, %v366_v51  ;;  %846 = vmatpush3.msra.mxu1 %v272_v46 }
  0x53   :  { %847 = vmatprep.mubr.msk.f32.mxu1 %vm81_vm1, %v548_v52  ;;  %829 = vmatmul.mubr.msk.f32.vlgmr.msra.gmra.mxu0 %vm81_vm1, %v367_v53 }
  0x54   :  { %848 = vmatmul.mubr.msk.f32.vlgmr.msra.gmra.mxu1 %vm81_vm1, %v549_v54 }
  0xf0   :  { %v754_v55 = vpop.f32.mrf.mxu0 }
  0xf1   :  { %v773_v56 = vpop.f32.mrf.mxu1 }
  0xf2   :  { %v179_v57 = vpop.f32.mrf.mxu0  ;;  %v266_v59 = vadd.f32 %v773_v56, %v754_v55 }
  0xf3   :  { %v260_v58 = vpop.f32.mrf.mxu1 }
  0xf4   :  { %v261_v61 = vadd.f32 %v260_v58, %v179_v57 }
 0x101   :  { %v792_v60 = vpop.f32.mrf.mxu0 }
 0x102   :  { %v362_v62 = vadd.f32 %v792_v60, %v266_v59 }
 0x103   :  { %v352_v63 = vpop.f32.mrf.mxu0  ;;  %v811_v1 = vpop.f32.mrf.mxu1 }
 0x104   :  { %364 = vst [vmem:[#allocation8 + $0x8] sm:$0xff] %v362_v62  ;;  %v361_v0 = vadd.f32 %v352_v63, %v261_v61 }
 0x105   :  { %v458_v2 = vpop.f32.mrf.mxu1 }
 0x106   :  { %363 = vst [vmem:[#allocation8] sm:$0xff] %v361_v0 }
 0x113   :  { %v830_v3 = vpop.f32.mrf.mxu0 }
 0x114   :  { %v849_v4 = vpop.f32.mrf.mxu1  ;;  %v545_v5 = vadd.f32 %v830_v3, %v811_v1 }
 0x115   :  { %v539_v6 = vpop.f32.mrf.mxu0 }
 0x116   :  { %v640_v7 = vadd.f32 %v849_v4, %v545_v5  ;;  %v540_v8 = vadd.f32 %v539_v6, %v458_v2  ;;  %v630_v9 = vpop.f32.mrf.mxu1 }
 0x118   :  { %643 = vst [vmem:[#allocation8 + $0x18] sm:$0xff] %v640_v7  ;;  %v639_v10 = vadd.f32 %v630_v9, %v540_v8 }
 0x11a   :  { %642 = vst [vmem:[#allocation8 + $0x10] sm:$0xff] %v639_v10 }
 0x11b   :  { %907 = shalt.err (!%p904_p0)
}
 0x11c   :  { %655 = dma.vmem_to_hbm [thread:$0]  %s650_s3, 512, %s1099_s4, [#allocation5], %s923_s18, %s923_s18, %s924_s19  }
 0x11d   :  { %920 = dma.done.wait [#allocation5], 512  }
 0x11e   :  { %921 = vsyncadd [#allocation5], 4294966784 }
 0x11f   :  { %659 = vsyncpa [#allocation4], 1 }
 0x120   :  { %660 = vsyncpa [#allocation7], 1 }
 0x121   :  { %661 = vsyncpa [#allocation5], 1 }

</bundles_post_ra>
